<compile_context>
chip_gen: v5e
topology: v5e:2x2
jax: 0.10.0
libtpu: 0.0.40
codegen_flags: <defaults>
</compile_context>

<pallas_src>
import functools
import math

import jax
import jax.numpy as jnp
from jax.experimental import pallas as pl
from jax.experimental.pallas import tpu as pltpu


# --------------------------------------------------------------------------- #
# Linear / QKV projection kernels (row-tiled, MXU matmul + bias)
# --------------------------------------------------------------------------- #

def _matmul_bias(x_ref, w_ref, b_ref, o_ref, *, mxu_dtype):
    # x: (TM, Din), w: (Din, Dout), b: (1, Dout) -> o: (TM, Dout)
    x = x_ref[...].astype(mxu_dtype)
    w = w_ref[...].astype(mxu_dtype)
    acc = jnp.dot(x, w, preferred_element_type=jnp.float32)
    o_ref[...] = (acc + b_ref[...]).astype(o_ref.dtype)


def _linear_kernel(x_ref, w_ref, b_ref, o_ref, *, mxu_dtype):
    _matmul_bias(x_ref, w_ref, b_ref, o_ref, mxu_dtype=mxu_dtype)


def _qkv_kernel(xq_ref, xk_ref, xv_ref,
                wq_ref, wk_ref, wv_ref,
                bq_ref, bk_ref, bv_ref,
                q_ref, k_ref, v_ref, *, mxu_dtype):
    # Three projections per row tile in one pallas_call: amortizes launch /
    # pipeline-warmup overhead of three separate kernels.
    _matmul_bias(xq_ref, wq_ref, bq_ref, q_ref, mxu_dtype=mxu_dtype)
    _matmul_bias(xk_ref, wk_ref, bk_ref, k_ref, mxu_dtype=mxu_dtype)
    _matmul_bias(xv_ref, wv_ref, bv_ref, v_ref, mxu_dtype=mxu_dtype)


def pallas_linear(x2d, w, b, *, block_rows=256, mxu_dtype=jnp.float32):
    """x2d: (N, Din), w: (Din, Dout), b: (1, Dout) -> (N, Dout)."""
    N, Din = x2d.shape
    Dout = w.shape[1]
    tm = min(block_rows, N)
    return pl.pallas_call(
        functools.partial(_linear_kernel, mxu_dtype=mxu_dtype),
        out_shape=jax.ShapeDtypeStruct((N, Dout), x2d.dtype),
        grid=(pl.cdiv(N, tm),),
        in_specs=[
            pl.BlockSpec((tm, Din), lambda i: (i, 0)),      # row tile of x
            pl.BlockSpec((Din, Dout), lambda i: (0, 0)),    # W resident
            pl.BlockSpec((1, Dout), lambda i: (0, 0)),      # b resident
        ],
        out_specs=pl.BlockSpec((tm, Dout), lambda i: (i, 0)),
        compiler_params=pltpu.CompilerParams(dimension_semantics=("parallel",)),
    )(x2d, w, b)


def pallas_qkv_projection(xq, xk, xv, wq, wk, wv, bq, bk, bv, *,
                          block_rows=256, mxu_dtype=jnp.float32):
    """Fused Q/K/V input projections: one pallas_call, three outputs (N, Dout)."""
    N, Din = xq.shape
    Dout = wq.shape[1]
    tm = min(block_rows, N)
    x_spec = pl.BlockSpec((tm, Din), lambda i: (i, 0))
    w_spec = pl.BlockSpec((Din, Dout), lambda i: (0, 0))
    b_spec = pl.BlockSpec((1, Dout), lambda i: (0, 0))
    o_spec = pl.BlockSpec((tm, Dout), lambda i: (i, 0))
    out_sds = jax.ShapeDtypeStruct((N, Dout), xq.dtype)
    return pl.pallas_call(
        functools.partial(_qkv_kernel, mxu_dtype=mxu_dtype),
        out_shape=(out_sds, out_sds, out_sds),
        grid=(pl.cdiv(N, tm),),
        in_specs=[x_spec, x_spec, x_spec,
                  w_spec, w_spec, w_spec,
                  b_spec, b_spec, b_spec],
        out_specs=(o_spec, o_spec, o_spec),
        compiler_params=pltpu.CompilerParams(dimension_semantics=("parallel",)),
    )(xq, xk, xv, wq, wk, wv, bq, bk, bv)


# --------------------------------------------------------------------------- #
# Flash-attention-style scaled-dot-product attention
# --------------------------------------------------------------------------- #

def _flash_attn_kernel(q_ref, k_ref, v_ref, o_ref, m_ref, l_ref, acc_ref,
                       *, scale, mxu_dtype):
    # Blocks: q/o (1, Hb, TQ, dk), k/v (1, Hb, TK, dk).
    ki = pl.program_id(3)

    @pl.when(ki == 0)
    def _():
        m_ref[...] = jnp.full(m_ref.shape, -jnp.inf, dtype=jnp.float32)
        l_ref[...] = jnp.zeros(l_ref.shape, dtype=jnp.float32)
        acc_ref[...] = jnp.zeros(acc_ref.shape, dtype=jnp.float32)

    # Scale in fp32, then (optionally) cast only the MXU operands to bf16.
    q = (q_ref[0].astype(jnp.float32) * scale).astype(mxu_dtype)   # (Hb, TQ, dk)
    k = k_ref[0].astype(mxu_dtype)                                 # (Hb, TK, dk)
    v = v_ref[0].astype(mxu_dtype)                                 # (Hb, TK, dk)

    # Batched "NT" matmul: contract d_k of q against d_k of k directly
    # (no explicit K transpose / XLU work).
    s = jnp.einsum("hqd,hkd->hqk", q, k,
                   preferred_element_type=jnp.float32)             # (Hb, TQ, TK)

    # Online (streaming) softmax; statistics stay fp32.
    m_prev = m_ref[...]
    m_new = jnp.maximum(m_prev, jnp.max(s, axis=-1, keepdims=True))
    alpha = jnp.exp(m_prev - m_new)
    p = jnp.exp(s - m_new)
    l_ref[...] = alpha * l_ref[...] + jnp.sum(p, axis=-1, keepdims=True)
    acc_ref[...] = alpha * acc_ref[...] + jnp.einsum(
        "hqk,hkd->hqd", p.astype(mxu_dtype), v,
        preferred_element_type=jnp.float32)
    m_ref[...] = m_new

    @pl.when(ki == pl.num_programs(3) - 1)
    def _():
        inv_l = pl.reciprocal(l_ref[...], approx=True)   # EUP slot, ~free
        o_ref[0] = (acc_ref[...] * inv_l).astype(o_ref.dtype)


def pallas_attention(q, k, v, *, block_q=128, block_k=128, block_h=None,
                     mxu_dtype=jnp.float32):
    """q/k/v: (B, H, S, d_k) -> (B, H, S, d_k).

    VMEM use is O(block_h * (TQ*TK + (TQ+TK)*d_k)) -- bounded, never the full
    (S, S) score matrix, so it scales to long S and fits v7x's 64 MiB VMEM.
    """
    B, H, S, d_k = q.shape
    block_h = H if block_h is None else block_h
    tq = min(block_q, S)
    tk = min(block_k, S)
    assert H % block_h == 0, "num_heads must be divisible by block_h"
    assert S % tq == 0 and S % tk == 0, "seq length must be divisible by tiles"
    scale = 1.0 / math.sqrt(d_k)

    grid = (B, H // block_h, S // tq, S // tk)
    q_spec = pl.BlockSpec((1, block_h, tq, d_k), lambda b, h, qi, ki: (b, h, qi, 0))
    kv_spec = pl.BlockSpec((1, block_h, tk, d_k), lambda b, h, qi, ki: (b, h, ki, 0))
    o_spec = pl.BlockSpec((1, block_h, tq, d_k), lambda b, h, qi, ki: (b, h, qi, 0))

    return pl.pallas_call(
        functools.partial(_flash_attn_kernel, scale=scale, mxu_dtype=mxu_dtype),
        out_shape=jax.ShapeDtypeStruct((B, H, S, d_k), q.dtype),
        grid=grid,
        in_specs=[q_spec, kv_spec, kv_spec],
        out_specs=o_spec,
        scratch_shapes=[
            pltpu.VMEM((block_h, tq, 1), jnp.float32),     # running max m
            pltpu.VMEM((block_h, tq, 1), jnp.float32),     # running sum l
            pltpu.VMEM((block_h, tq, d_k), jnp.float32),   # fp32 accumulator
        ],
        compiler_params=pltpu.CompilerParams(
            dimension_semantics=("parallel", "parallel", "parallel", "arbitrary")),
    )(q, k, v)


# --------------------------------------------------------------------------- #
# Multi-head attention forward
# --------------------------------------------------------------------------- #

def multi_head_attention(query, key, value, params, num_heads, *,
                         mxu_dtype=jnp.float32):
    """query/key/value: (B, S, d_model). Returns (B, S, d_model)."""
    B, S, D = query.shape
    d_k = D // num_heads
    N = B * S

    Q, K, V = pallas_qkv_projection(
        query.reshape(N, D), key.reshape(N, D), value.reshape(N, D),
        params["wq"], params["wk"], params["wv"],
        params["bq"], params["bk"], params["bv"],
        mxu_dtype=mxu_dtype)

    # (N, D) -> (B, H, S, d_k).  The reshape is free; the transpose is one XLA
    # copy per tensor.  Folding the head split into the attention BlockSpecs
    # would require lane-slicing D into d_k-wide blocks, which violates the
    # (8, 128) lane constraint whenever d_k < 128.
    # TODO(synk): for models with d_k a multiple of 128, fuse the head
    #             split/merge into the attention index_maps to drop these copies.
    def split_heads(x):
        return x.reshape(B, S, num_heads, d_k).transpose(0, 2, 1, 3)

    x = pallas_attention(split_heads(Q), split_heads(K), split_heads(V),
                         mxu_dtype=mxu_dtype)           # (B, H, S, d_k)
    x = x.transpose(0, 2, 1, 3).reshape(N, D)           # merge heads

    out = pallas_linear(x, params["wo"], params["bo"], mxu_dtype=mxu_dtype)
    return out.reshape(B, S, D)


# --------------------------------------------------------------------------- #
# Reference (pure JAX)
# --------------------------------------------------------------------------- #

def reference_mha(query, key, value, params, num_heads):
    B, S, D = query.shape
    d_k = D // num_heads
    Q = query @ params["wq"] + params["bq"]
    K = key   @ params["wk"] + params["bk"]
    V = value @ params["wv"] + params["bv"]
    Q = Q.reshape(B, S, num_heads, d_k).transpose(0, 2, 1, 3) / math.sqrt(d_k)
    K = K.reshape(B, S, num_heads, d_k).transpose(0, 2, 1, 3)
    V = V.reshape(B, S, num_heads, d_k).transpose(0, 2, 1, 3)
    s = jnp.einsum("bhqd,bhkd->bhqk", Q, K)
    a = jax.nn.softmax(s, axis=-1)
    x = jnp.einsum("bhqk,bhkd->bhqd", a, V)
    x = x.transpose(0, 2, 1, 3).reshape(B, S, D)
    return x @ params["wo"] + params["bo"]


# --------------------------------------------------------------------------- #
# Main
# --------------------------------------------------------------------------- #

if __name__ == "__main__":
    B, S, D, H = 2, 8, 32, 4

    key0 = jax.random.PRNGKey(0)
    ks = jax.random.split(key0, 12)

    bound = 1.0 / math.sqrt(D)  # PyTorch nn.Linear default init bound

    def u(k, shape):
        return jax.random.uniform(k, shape, jnp.float32, -bound, bound)

    params = {
        "wq": u(ks[0], (D, D)), "bq": u(ks[1], (1, D)),
        "wk": u(ks[2], (D, D)), "bk": u(ks[3], (1, D)),
        "wv": u(ks[4], (D, D)), "bv": u(ks[5], (1, D)),
        "wo": u(ks[6], (D, D)), "bo": u(ks[7], (1, D)),
    }

    query = jax.random.normal(ks[8],  (B, S, D), jnp.float32)
    keyx  = jax.random.normal(ks[9],  (B, S, D), jnp.float32)
    value = jax.random.normal(ks[10], (B, S, D), jnp.float32)

    ref = reference_mha(query, keyx, value, params, H)

    # fp32 MXU operands (tolerance covers the EUP approximate reciprocal).
    out = multi_head_attention(query, keyx, value, params, H)
    out = jax.block_until_ready(out)
    assert out.shape == (B, S, D)
    assert jnp.allclose(out, ref, atol=2e-3, rtol=2e-3), "fp32 path mismatch"

    # bf16 MXU-operand fast path (fp32 accumulation, fp32 softmax statistics),
    # the recommended configuration for v6e / v7x.
    out_bf16 = jax.block_until_ready(
        multi_head_attention(query, keyx, value, params, H,
                             mxu_dtype=jnp.bfloat16))
    assert jnp.allclose(out_bf16, ref, atol=5e-2, rtol=5e-2), "bf16 path mismatch"

    print("KERNEL_OK")
</pallas_src>

<mosaic_0001>
module attributes {stable_mosaic.version = 11 : i64} {
  func.func @_qkv_kernel(%arg0: i32, %arg1: memref<16x32xf32, #tpu.memory_space<vmem>>, %arg2: memref<16x32xf32, #tpu.memory_space<vmem>>, %arg3: memref<16x32xf32, #tpu.memory_space<vmem>>, %arg4: memref<32x32xf32, #tpu.memory_space<vmem>>, %arg5: memref<32x32xf32, #tpu.memory_space<vmem>>, %arg6: memref<32x32xf32, #tpu.memory_space<vmem>>, %arg7: memref<1x32xf32, #tpu.memory_space<vmem>>, %arg8: memref<1x32xf32, #tpu.memory_space<vmem>>, %arg9: memref<1x32xf32, #tpu.memory_space<vmem>>, %arg10: memref<16x32xf32, #tpu.memory_space<vmem>>, %arg11: memref<16x32xf32, #tpu.memory_space<vmem>>, %arg12: memref<16x32xf32, #tpu.memory_space<vmem>>) attributes {dimension_semantics = [#tpu.dimension_semantics<parallel>], iteration_bounds = array<i64: 1>, scalar_prefetch = 0 : i64, scratch_operands = 0 : i64, tpu.core_type = #tpu.core_type<tc>, window_params = [{transform_indices = @transform_0, window_bounds = array<i64: 16, 32>}, {transform_indices = @transform_1, window_bounds = array<i64: 16, 32>}, {transform_indices = @transform_2, window_bounds = array<i64: 16, 32>}, {pipeline_mode = #tpu.pipeline_mode<synchronous>, transform_indices = @transform_3, window_bounds = array<i64: 32, 32>}, {pipeline_mode = #tpu.pipeline_mode<synchronous>, transform_indices = @transform_4, window_bounds = array<i64: 32, 32>}, {pipeline_mode = #tpu.pipeline_mode<synchronous>, transform_indices = @transform_5, window_bounds = array<i64: 32, 32>}, {pipeline_mode = #tpu.pipeline_mode<synchronous>, transform_indices = @transform_6, window_bounds = array<i64: 1, 32>}, {pipeline_mode = #tpu.pipeline_mode<synchronous>, transform_indices = @transform_7, window_bounds = array<i64: 1, 32>}, {pipeline_mode = #tpu.pipeline_mode<synchronous>, transform_indices = @transform_8, window_bounds = array<i64: 1, 32>}, {transform_indices = @transform_9, window_bounds = array<i64: 16, 32>}, {transform_indices = @transform_10, window_bounds = array<i64: 16, 32>}, {transform_indices = @transform_11, window_bounds = array<i64: 16, 32>}]} {
    %c0 = arith.constant 0 : index
    %c0_0 = arith.constant 0 : index
    %0 = vector.load %arg1[%c0, %c0_0] : memref<16x32xf32, #tpu.memory_space<vmem>>, vector<16x32xf32>
    %c0_1 = arith.constant 0 : index
    %c0_2 = arith.constant 0 : index
    %1 = vector.load %arg4[%c0_1, %c0_2] : memref<32x32xf32, #tpu.memory_space<vmem>>, vector<32x32xf32>
    %cst = arith.constant dense<0.000000e+00> : vector<16x32xf32>
    %2 = tpu.matmul %0, %1, %cst {dimension_numbers = #tpu.dot_dimension_numbers<[1], [0], [0], [1], [0, 0, 1, 1], [], []>} : vector<16x32xf32>, vector<32x32xf32>, vector<16x32xf32> -> vector<16x32xf32>
    %c0_3 = arith.constant 0 : index
    %c0_4 = arith.constant 0 : index
    %3 = vector.load %arg7[%c0_3, %c0_4] : memref<1x32xf32, #tpu.memory_space<vmem>>, vector<1x32xf32>
    %4 = vector.broadcast %3 : vector<1x32xf32> to vector<16x32xf32>
    %5 = arith.addf %2, %4 : vector<16x32xf32>
    %c0_5 = arith.constant 0 : index
    %c0_6 = arith.constant 0 : index
    %6 = vector.load %arg10[%c0_5, %c0_6] : memref<16x32xf32, #tpu.memory_space<vmem>>, vector<16x32xf32>
    tpu.vector_store %arg10[%c0_5, %c0_6], %5 {strides = array<i32>} : memref<16x32xf32, #tpu.memory_space<vmem>>, vector<16x32xf32>,
    %c0_7 = arith.constant 0 : index
    %c0_8 = arith.constant 0 : index
    %7 = vector.load %arg2[%c0_7, %c0_8] : memref<16x32xf32, #tpu.memory_space<vmem>>, vector<16x32xf32>
    %c0_9 = arith.constant 0 : index
    %c0_10 = arith.constant 0 : index
    %8 = vector.load %arg5[%c0_9, %c0_10] : memref<32x32xf32, #tpu.memory_space<vmem>>, vector<32x32xf32>
    %cst_11 = arith.constant dense<0.000000e+00> : vector<16x32xf32>
    %9 = tpu.matmul %7, %8, %cst_11 {dimension_numbers = #tpu.dot_dimension_numbers<[1], [0], [0], [1], [0, 0, 1, 1], [], []>} : vector<16x32xf32>, vector<32x32xf32>, vector<16x32xf32> -> vector<16x32xf32>
    %c0_12 = arith.constant 0 : index
    %c0_13 = arith.constant 0 : index
    %10 = vector.load %arg8[%c0_12, %c0_13] : memref<1x32xf32, #tpu.memory_space<vmem>>, vector<1x32xf32>
    %11 = vector.broadcast %10 : vector<1x32xf32> to vector<16x32xf32>
    %12 = arith.addf %9, %11 : vector<16x32xf32>
    %c0_14 = arith.constant 0 : index
    %c0_15 = arith.constant 0 : index
    %13 = vector.load %arg11[%c0_14, %c0_15] : memref<16x32xf32, #tpu.memory_space<vmem>>, vector<16x32xf32>
    tpu.vector_store %arg11[%c0_14, %c0_15], %12 {strides = array<i32>} : memref<16x32xf32, #tpu.memory_space<vmem>>, vector<16x32xf32>,
    %c0_16 = arith.constant 0 : index
    %c0_17 = arith.constant 0 : index
    %14 = vector.load %arg3[%c0_16, %c0_17] : memref<16x32xf32, #tpu.memory_space<vmem>>, vector<16x32xf32>
    %c0_18 = arith.constant 0 : index
    %c0_19 = arith.constant 0 : index
    %15 = vector.load %arg6[%c0_18, %c0_19] : memref<32x32xf32, #tpu.memory_space<vmem>>, vector<32x32xf32>
    %cst_20 = arith.constant dense<0.000000e+00> : vector<16x32xf32>
    %16 = tpu.matmul %14, %15, %cst_20 {dimension_numbers = #tpu.dot_dimension_numbers<[1], [0], [0], [1], [0, 0, 1, 1], [], []>} : vector<16x32xf32>, vector<32x32xf32>, vector<16x32xf32> -> vector<16x32xf32>
    %c0_21 = arith.constant 0 : index
    %c0_22 = arith.constant 0 : index
    %17 = vector.load %arg9[%c0_21, %c0_22] : memref<1x32xf32, #tpu.memory_space<vmem>>, vector<1x32xf32>
    %18 = vector.broadcast %17 : vector<1x32xf32> to vector<16x32xf32>
    %19 = arith.addf %16, %18 : vector<16x32xf32>
    %c0_23 = arith.constant 0 : index
    %c0_24 = arith.constant 0 : index
    %20 = vector.load %arg12[%c0_23, %c0_24] : memref<16x32xf32, #tpu.memory_space<vmem>>, vector<16x32xf32>
    tpu.vector_store %arg12[%c0_23, %c0_24], %19 {strides = array<i32>} : memref<16x32xf32, #tpu.memory_space<vmem>>, vector<16x32xf32>,
    return
  }
  func.func @transform_0(%arg0: i32) -> (i32, i32) {
    %c0_i32 = arith.constant 0 : i32
    %c0_i32_0 = arith.constant 0 : i32
    return %arg0, %c0_i32 : i32, i32
  }
  func.func @transform_1(%arg0: i32) -> (i32, i32) {
    %c0_i32 = arith.constant 0 : i32
    %c0_i32_0 = arith.constant 0 : i32
    return %arg0, %c0_i32 : i32, i32
  }
  func.func @transform_2(%arg0: i32) -> (i32, i32) {
    %c0_i32 = arith.constant 0 : i32
    %c0_i32_0 = arith.constant 0 : i32
    return %arg0, %c0_i32 : i32, i32
  }
  func.func @transform_3(%arg0: i32) -> (i32, i32) {
    %c0_i32 = arith.constant 0 : i32
    %c0_i32_0 = arith.constant 0 : i32
    %c0_i32_1 = arith.constant 0 : i32
    return %c0_i32, %c0_i32_0 : i32, i32
  }
  func.func @transform_4(%arg0: i32) -> (i32, i32) {
    %c0_i32 = arith.constant 0 : i32
    %c0_i32_0 = arith.constant 0 : i32
    %c0_i32_1 = arith.constant 0 : i32
    return %c0_i32, %c0_i32_0 : i32, i32
  }
  func.func @transform_5(%arg0: i32) -> (i32, i32) {
    %c0_i32 = arith.constant 0 : i32
    %c0_i32_0 = arith.constant 0 : i32
    %c0_i32_1 = arith.constant 0 : i32
    return %c0_i32, %c0_i32_0 : i32, i32
  }
  func.func @transform_6(%arg0: i32) -> (i32, i32) {
    %c0_i32 = arith.constant 0 : i32
    %c0_i32_0 = arith.constant 0 : i32
    %c0_i32_1 = arith.constant 0 : i32
    return %c0_i32, %c0_i32_0 : i32, i32
  }
  func.func @transform_7(%arg0: i32) -> (i32, i32) {
    %c0_i32 = arith.constant 0 : i32
    %c0_i32_0 = arith.constant 0 : i32
    %c0_i32_1 = arith.constant 0 : i32
    return %c0_i32, %c0_i32_0 : i32, i32
  }
  func.func @transform_8(%arg0: i32) -> (i32, i32) {
    %c0_i32 = arith.constant 0 : i32
    %c0_i32_0 = arith.constant 0 : i32
    %c0_i32_1 = arith.constant 0 : i32
    return %c0_i32, %c0_i32_0 : i32, i32
  }
  func.func @transform_9(%arg0: i32) -> (i32, i32) {
    %c0_i32 = arith.constant 0 : i32
    %c0_i32_0 = arith.constant 0 : i32
    return %arg0, %c0_i32 : i32, i32
  }
  func.func @transform_10(%arg0: i32) -> (i32, i32) {
    %c0_i32 = arith.constant 0 : i32
    %c0_i32_0 = arith.constant 0 : i32
    return %arg0, %c0_i32 : i32, i32
  }
  func.func @transform_11(%arg0: i32) -> (i32, i32) {
    %c0_i32 = arith.constant 0 : i32
    %c0_i32_0 = arith.constant 0 : i32
    return %arg0, %c0_i32 : i32, i32
  }
}

</mosaic_0001>

<bundles_post_ra>
// kernel: tpu_custom_call.1
= control target key start
LH: loop header
LB: loop body
LE: loop exit
PB: predicated region body
PF: predicated region fallthrough
CT: control target
= control target key end

     0   :  { %17 = vsyncpa [#allocation3], 0  ;;  %s710_s0 = inlined_call_operand.hbm [shape: f32[16,32], index: 0, kind: input, shape index: {}]   ;;  %s711_s1 = inlined_call_operand.hbm [shape: f32[16,32], index: 1, kind: input, shape index: {}]   ;;  %s712_s2 = inlined_call_operand.hbm [shape: f32[16,32], index: 2, kind: input, shape index: {}]   ;;  %s713_s3 = inlined_call_operand.hbm [shape: f32[32,32], index: 3, kind: input, shape index: {}]   ;;  %s714_s4 = inlined_call_operand.hbm [shape: f32[32,32], index: 4, kind: input, shape index: {}]   ;;  %s715_s5 = inlined_call_operand.hbm [shape: f32[32,32], index: 5, kind: input, shape index: {}]   ;;  %s716_s6 = inlined_call_operand.vmem [shape: f32[1,32], index: 6, kind: input, shape index: {}]   ;;  %s717_s7 = inlined_call_operand.vmem [shape: f32[1,32], index: 7, kind: input, shape index: {}]   ;;  %s718_s8 = inlined_call_operand.vmem [shape: f32[1,32], index: 8, kind: input, shape index: {}]   ;;  %s719_s9 = inlined_call_operand.hbm [shape: f32[16,32], index: 9, kind: output, shape index: {0}]   ;;  %s720_s10 = inlined_call_operand.hbm [shape: f32[16,32], index: 10, kind: output, shape index: {1}]   ;;  %s721_s11 = inlined_call_operand.hbm [shape: f32[16,32], index: 11, kind: output, shape index: {2}]  }
   0x1   :  { %18 = vsyncpa [#allocation6], 0 }
   0x2   :  { %19 = vsyncpa [#allocation9], 0 }
   0x3   :  { %20 = vsyncpa [#allocation12], 0 }
   0x4   :  { %21 = vsyncpa [#allocation4], 0 }
   0x5   :  { %22 = vsyncpa [#allocation15], 0  ;;  %s40_s19 = sshll.u32 %s711_s1, 4  ;;  %s564_s20 = smov [#allocation5]   ;;  %s41_s19 = int_to_ptr.hbm [resolvable:$true] %s40_s19 }
   0x6   :  { %s42_s21 = sshll.u32 %s564_s20, 4  ;;  %s66_s24 = sshll.u32 %s713_s3, 4  ;;  %s43_s21 = int_to_ptr.vmem [resolvable:$true] %s42_s21  ;;  %s67_s24 = int_to_ptr.hbm [resolvable:$true] %s66_s24 }
   0x7   :  { %s565_s25 = smov 128   ;;  %s566_s26 = smov 8  }
   0x8   :  { %48 = dma.hbm_to_vmem [thread:$0]  %s41_s19, 256, %s43_s21, [#allocation6], %s565_s25, %s565_s25, %s566_s26  }
   0x9   :  { %s567_s27 = smov [#allocation8]   ;;  %s27_s1 = sshll.u32 %s710_s0, 4  ;;  %s28_s1 = int_to_ptr.hbm [resolvable:$true] %s27_s1 }
   0xa   :  { %s68_s28 = sshll.u32 %s567_s27, 4  ;;  %s53_s13 = sshll.u32 %s712_s2, 4  ;;  %s69_s28 = int_to_ptr.vmem [resolvable:$true] %s68_s28  ;;  %s54_s13 = int_to_ptr.hbm [resolvable:$true] %s53_s13 }
   0xb   :  { %74 = dma.hbm_to_vmem [thread:$0]  %s67_s24, 512, %s69_s28, [#allocation9], %s565_s25, %s565_s25, %s566_s26  }
   0xc   :  { %s568_s14 = smov [#allocation2]   ;;  %s569_s16 = smov [#allocation7]  }
   0xd   :  { %s29_s15 = sshll.u32 %s568_s14, 4  ;;  %s55_s0 = sshll.u32 %s569_s16, 4  ;;  %s30_s15 = int_to_ptr.vmem [resolvable:$true] %s29_s15  ;;  %s56_s0 = int_to_ptr.vmem [resolvable:$true] %s55_s0 }
   0xe   :  { %35 = dma.hbm_to_vmem [thread:$0]  %s28_s1, 256, %s30_s15, [#allocation3], %s565_s25, %s565_s25, %s566_s26  }
   0xf   :  { %s79_s19 = sshll.u32 %s714_s4, 4  ;;  %s92_s21 = sshll.u32 %s715_s5, 4  ;;  %s80_s19 = int_to_ptr.hbm [resolvable:$true] %s79_s19  ;;  %s93_s21 = int_to_ptr.hbm [resolvable:$true] %s92_s21 }
  0x10   :  { %61 = dma.hbm_to_vmem [thread:$0]  %s54_s13, 256, %s56_s0, [#allocation6], %s565_s25, %s565_s25, %s566_s26  }
  0x11   :  { %s570_s22 = smov [#allocation10]   ;;  %s571_s24 = smov [#allocation11]  }
  0x12   :  { %s81_s23 = sshll.u32 %s570_s22, 4  ;;  %s94_s4 = sshll.u32 %s571_s24, 4  ;;  %s82_s23 = int_to_ptr.vmem [resolvable:$true] %s81_s23  ;;  %s95_s4 = int_to_ptr.vmem [resolvable:$true] %s94_s4 }
  0x13   :  { %87 = dma.hbm_to_vmem [thread:$0]  %s80_s19, 512, %s82_s23, [#allocation9], %s565_s25, %s565_s25, %s566_s26  }
  0x14   :  { %100 = dma.hbm_to_vmem [thread:$0]  %s93_s21, 512, %s95_s4, [#allocation12], %s565_s25, %s565_s25, %s566_s26  }
  0x15   :  { %552 = dma.done.wait [#allocation3], 256  }
  0x16   :  { %553 = vsyncadd [#allocation3], 4294967040 }
  0x17   :  { %554 = dma.done.wait [#allocation6], 512  }
  0x18   :  { %555 = vsyncadd [#allocation6], 4294966784 }
  0x19   :  { %556 = dma.done.wait [#allocation9], 1024  }
  0x1a   :  { %557 = vsyncadd [#allocation9], 4294966272 }
  0x1b   :  { %558 = dma.done.wait [#allocation12], 512  }
  0x1c   :  { %559 = vsyncadd [#allocation12], 4294966784  ;;  %v219_v0 = vld [vmem:[#allocation11 + $0x18] sm:$0xff]  ;;  %v218_v1 = vld [vmem:[#allocation11 + $0x10] sm:$0xff]  ;;  %vm141_vm0 = vcmask 261120   ;;  %s572_s3 = smov [#allocation13]  }
  0x1d   :  { %242 = vmatpush.msra.mxu2 %v219_v0  ;;  %v178_v2 = vld [vmem:[#allocation10 + $0x18] sm:$0xff]  ;;  %v177_v3 = vld [vmem:[#allocation10 + $0x10] sm:$0xff]  ;;  %v217_v4 = vld [vmem:[#allocation11 + $0x8] sm:$0xff]  ;;  %s259_s12 = sshll.u32 %s572_s3, 4  ;;  %s573_s15 = smov [#allocation14]   ;;  %s260_s12 = int_to_ptr.vmem [resolvable:$true] %s259_s12 }
  0x1e   :  { %201 = vmatpush.msra.mxu1 %v178_v2  ;;  %v136_v5 = vld [vmem:[#allocation8 + $0x18] sm:$0xff]  ;;  %v176_v6 = vld [vmem:[#allocation10 + $0x8] sm:$0xff]  ;;  %v135_v7 = vld [vmem:[#allocation8 + $0x10] sm:$0xff]  ;;  %s272_s16 = sshll.u32 %s573_s15, 4  ;;  %s274_s17 = sshll.u32 %s720_s10, 4  ;;  %s273_s16 = int_to_ptr.vmem [resolvable:$true] %s272_s16  ;;  %s275_s17 = int_to_ptr.hbm [resolvable:$true] %s274_s17 }
  0x1f   :  { %243 = vmatpush.msra.mxu2 %v218_v1  ;;  %318 = vmatpush.msra.mxu3 %v136_v5  ;;  %v216_v8 = vld [vmem:[#allocation11] sm:$0xff]  ;;  %v134_v9 = vld [vmem:[#allocation8 + $0x8] sm:$0xff]  ;;  %v214_v10 = vld [vmem:[#allocation7] sm:$0xff]  ;;  %s287_s10 = sshll.u32 %s721_s11, 4  ;;  %s288_s10 = int_to_ptr.hbm [resolvable:$true] %s287_s10 }
  0x20   :  { %202 = vmatpush.msra.mxu1 %v177_v3  ;;  %160 = vmatpush.msra.mxu0 %v136_v5  ;;  %v175_v11 = vld [vmem:[#allocation10] sm:$0xff]  ;;  %v132_v14 = vld [vmem:[#allocation2 + $0x8] sm:$0xff]  ;;  %v131_v15 = vld [vmem:[#allocation2] sm:$0xff] }
  0x21   :  { %244 = vmatpush.msra.mxu2 %v217_v4  ;;  %319 = vmatpush.msra.mxu3 %v135_v7  ;;  %v173_v12 = vld [vmem:[#allocation5] sm:$0xff]  ;;  %v215_v16 = vld [vmem:[#allocation7 + $0x8] sm:$0xff]  ;;  %v174_v17 = vld [vmem:[#allocation5 + $0x8] sm:$0xff] }
  0x22   :  { %203 = vmatpush.msra.mxu1 %v176_v6  ;;  %v133_v13 = vld [vmem:[#allocation8] sm:$0xff]  ;;  %161 = vmatpush.msra.mxu0 %v135_v7  ;;  %v333_v18 = vld [vmem:[%s717_s7] ss:$0 sm:$0xff]  ;;  %s261_s7 = sshll.u32 %s719_s9, 4  ;;  %s262_s7 = int_to_ptr.hbm [resolvable:$true] %s261_s7 }
  0x23   :  { %245 = vmatpush.msra.mxu2 %v216_v8  ;;  %320 = vmatpush.msra.mxu3 %v134_v9  ;;  %v335_v21 = vld [vmem:[%s716_s6] ss:$0 sm:$0xff] }
  0x24   :  { %316 = vmatmul.msk.f32.vlgmr.msra.gmra.mxu2 %vm141_vm0, %v214_v10  ;;  %204 = vmatpush.msra.mxu1 %v175_v11  ;;  %v334_v22 = vld [vmem:[%s718_s8] ss:$0 sm:$0xff]  ;;  %s574_s8 = smov [#allocation16]  }
  0x25   :  { %314 = vmatmul.msk.f32.vlgmr.msra.gmra.mxu1 %vm141_vm0, %v173_v12  ;;  %321 = vmatpush.msra.mxu3 %v133_v13  ;;  %s285_s9 = sshll.u32 %s574_s8, 4  ;;  %s286_s9 = int_to_ptr.vmem [resolvable:$true] %s285_s9 }
  0x26   :  { %313 = vmatmul.msk.f32.vlgmr.msra.gmra.mxu3 %vm141_vm0, %v132_v14  ;;  %162 = vmatpush.msra.mxu0 %v134_v9 }
  0x28   :  { %163 = vmatpush.msra.mxu0 %v133_v13 }
  0x29   :  { %312 = vmatmul.msk.f32.vlgmr.msra.gmra.mxu0 %vm141_vm0, %v131_v15 }
  0x2c   :  { %317 = vmatmul.msk.f32.gmra.mxu2 %vm141_vm0, %v215_v16 }
  0x2d   :  { %315 = vmatmul.msk.f32.gmra.mxu1 %vm141_vm0, %v174_v17 }
  0xa2   :  { %v206_v19 = vpop.f32.mrf.mxu1 }
  0xa3   :  { %v207_v20 = vadd.f32 %v333_v18, %v206_v19 }
  0xa5   :  { %212 = vst.msk [vmem:[#allocation14] sm:$0xff] %vm141_vm0, %v207_v20 }
  0xa6   :  { %v165_v23 = vpop.f32.mrf.mxu0 }
  0xa7   :  { %v247_v24 = vpop.f32.mrf.mxu2  ;;  %v166_v25 = vadd.f32 %v335_v21, %v165_v23 }
  0xa8   :  { %v248_v26 = vadd.f32 %v334_v22, %v247_v24 }
  0xa9   :  { %171 = vst.msk [vmem:[#allocation13] sm:$0xff] %vm141_vm0, %v166_v25  ;;  %v168_v27 = vpop.f32.mrf.mxu3 }
  0xaa   :  { %253 = vst.msk [vmem:[#allocation16] sm:$0xff] %vm141_vm0, %v248_v26  ;;  %v209_v28 = vpop.f32.mrf.mxu1  ;;  %v169_v29 = vadd.f32 %v335_v21, %v168_v27 }
  0xab   :  { %v210_v30 = vadd.f32 %v333_v18, %v209_v28 }
  0xac   :  { %172 = vst.msk [vmem:[#allocation13 + $0x8] sm:$0xff] %vm141_vm0, %v169_v29 }
  0xad   :  { %213 = vst.msk [vmem:[#allocation14 + $0x8] sm:$0xff] %vm141_vm0, %v210_v30  ;;  %267 = dma.vmem_to_hbm [thread:$0]  %s260_s12, 256, %s262_s7, [#allocation4], %s565_s25, %s565_s25, %s566_s26  }
  0xae   :  { %280 = dma.vmem_to_hbm [thread:$0]  %s273_s16, 256, %s275_s17, [#allocation15], %s565_s25, %s565_s25, %s566_s26  }
  0xaf   :  { %v250_v31 = vpop.f32.mrf.mxu2 }
  0xb0   :  { %v251_v32 = vadd.f32 %v334_v22, %v250_v31 }
  0xb2   :  { %254 = vst.msk [vmem:[#allocation16 + $0x8] sm:$0xff] %vm141_vm0, %v251_v32 }
  0xb3   :  { %293 = dma.vmem_to_hbm [thread:$0]  %s286_s9, 256, %s288_s10, [#allocation15], %s565_s25, %s565_s25, %s566_s26  }
  0xb4   :  { %560 = dma.done.wait [#allocation4], 256  }
  0xb5   :  { %561 = vsyncadd [#allocation4], 4294967040 }
  0xb6   :  { %562 = dma.done.wait [#allocation15], 512  }
  0xb7   :  { %563 = vsyncadd [#allocation15], 4294966784 }
  0xb8   :  { %306 = vsyncpa [#allocation3], 1 }
  0xb9   :  { %307 = vsyncpa [#allocation6], 1 }
  0xba   :  { %308 = vsyncpa [#allocation9], 1 }
  0xbb   :  { %309 = vsyncpa [#allocation12], 1 }
  0xbc   :  { %310 = vsyncpa [#allocation4], 1 }
  0xbd   :  { %311 = vsyncpa [#allocation15], 1 }

</bundles_post_ra>
